<compile_context>
chip_gen: v6e
topology: v6e:2x2x1
jax: 0.10.0
libtpu: 0.0.40
codegen_flags: <defaults>
</compile_context>

<pallas_src>
import jax
import jax.numpy as jnp
from jax.experimental import pallas as pl
from jax.experimental.pallas import tpu as pltpu

N_PAD = 128  # lane-dense output width (vreg lane count)


def _linear_add_relu_kernel(x_ref, wt_ref, bz_ref, o_ref):
    # x:  (B, K)       -- activations (only per-call input)
    # wt: (K, N_PAD)   -- weight.T, zero-padded along N, prepared once at init
    # bz: (1, N_PAD)   -- bias + y, zero-padded along N, prepared once at init
    v = jnp.dot(x_ref[...], wt_ref[...], preferred_element_type=jnp.float32)
    o_ref[...] = jnp.maximum(v + bz_ref[...], 0.0).astype(o_ref.dtype)


def prepare_params(weight, bias, y, n_pad=N_PAD):
    """One-time (module-init) preparation of constant operands.

    weight: (N, K) PyTorch nn.Linear layout; bias: (N,); y: (1, N).
    Returns wt_pad (K, n_pad) and bz_pad (1, n_pad).  These are constants of
    the module, so this runs once — never on the per-call path.
    """
    N, K = weight.shape
    wt_pad = jnp.zeros((K, n_pad), jnp.float32).at[:, :N].set(
        weight.T.astype(jnp.float32))
    bz = bias.astype(jnp.float32) + y.reshape(-1).astype(jnp.float32)
    bz_pad = jnp.zeros((1, n_pad), jnp.float32).at[:, :N].set(bz)
    return wt_pad, bz_pad


def linear_add_relu(x, wt_pad, bz_pad, n_out):
    """x: (B, K) activations. Returns relu(x @ W.T + bias + y) of shape (B, n_out)."""
    B = x.shape[0]
    n_pad = wt_pad.shape[1]
    out_pad = pl.pallas_call(
        _linear_add_relu_kernel,
        out_shape=jax.ShapeDtypeStruct((B, n_pad), x.dtype),
        in_specs=[
            pl.BlockSpec(memory_space=pltpu.VMEM),
            pl.BlockSpec(memory_space=pltpu.VMEM),
            pl.BlockSpec(memory_space=pltpu.VMEM),
        ],
        out_specs=pl.BlockSpec(memory_space=pltpu.VMEM),
    )(x, wt_pad, bz_pad)
    # Layout plumbing only: slice the lane-dense (B, 128) slab back to N.
    return out_pad[:, :n_out]


if __name__ == "__main__":
    key = jax.random.PRNGKey(0)
    kx, kb, ky = jax.random.split(key, 3)

    # Fixed weight from the module's __init__ (PyTorch Linear (N, K) layout).
    weight = jnp.array(
        [[-1.2, 4.2, 5.2, 0.2],
         [2.5, 2.4, 10.0, 1.8],
         [-1.5, -0.5, 2.7, -3.0],
         [1.2, -3.2, 1.5, 1.3]], dtype=jnp.float32)
    # nn.Linear bias is randomly initialized in PyTorch; deterministic here.
    bias = jax.random.uniform(kb, (4,), minval=-0.5, maxval=0.5,
                              dtype=jnp.float32)
    # TODO(synk): `y` is an undefined module-level global in the PyTorch
    # snippet; synthesized here as a deterministic (1, 4) tensor.
    y = jax.random.normal(ky, (1, 4), dtype=jnp.float32)

    x1 = jax.random.normal(kx, (1, 4), dtype=jnp.float32)

    # Module-init-time constant preparation (not on the per-call path).
    wt_pad, bz_pad = prepare_params(weight, bias, y)

    out = linear_add_relu(x1, wt_pad, bz_pad, n_out=4)
    jax.block_until_ready(out)

    # Cross-check against plain JAX reference of the module's forward pass.
    ref = jnp.maximum(x1 @ weight.T + bias + y, 0.0)
    assert jnp.allclose(out, ref, atol=1e-5), (out, ref)

    print("KERNEL_OK")
</pallas_src>

<mosaic_0001>
module attributes {stable_mosaic.version = 11 : i64} {
  func.func @_linear_add_relu_kernel(%arg0: memref<1x4xf32, #tpu.memory_space<vmem>>, %arg1: memref<4x128xf32, #tpu.memory_space<vmem>>, %arg2: memref<1x128xf32, #tpu.memory_space<vmem>>, %arg3: memref<1x128xf32, #tpu.memory_space<vmem>>) attributes {dimension_semantics = [], scalar_prefetch = 0 : i64, scratch_operands = 0 : i64, tpu.core_type = #tpu.core_type<tc>} {
    %c0 = arith.constant 0 : index
    %c0_0 = arith.constant 0 : index
    %0 = vector.load %arg0[%c0, %c0_0] : memref<1x4xf32, #tpu.memory_space<vmem>>, vector<1x4xf32>
    %c0_1 = arith.constant 0 : index
    %c0_2 = arith.constant 0 : index
    %1 = vector.load %arg1[%c0_1, %c0_2] : memref<4x128xf32, #tpu.memory_space<vmem>>, vector<4x128xf32>
    %cst = arith.constant dense<0.000000e+00> : vector<1x128xf32>
    %2 = tpu.matmul %0, %1, %cst {dimension_numbers = #tpu.dot_dimension_numbers<[1], [0], [0], [1], [0, 0, 1, 1], [], []>} : vector<1x4xf32>, vector<4x128xf32>, vector<1x128xf32> -> vector<1x128xf32>
    %c0_3 = arith.constant 0 : index
    %c0_4 = arith.constant 0 : index
    %3 = vector.load %arg2[%c0_3, %c0_4] : memref<1x128xf32, #tpu.memory_space<vmem>>, vector<1x128xf32>
    %4 = arith.addf %2, %3 : vector<1x128xf32>
    %cst_5 = arith.constant 0.000000e+00 : f32
    %5 = vector.broadcast %cst_5 : f32 to vector<1x128xf32>
    %6 = arith.maximumf %4, %5 : vector<1x128xf32>
    %c0_6 = arith.constant 0 : index
    %c0_7 = arith.constant 0 : index
    %7 = vector.load %arg3[%c0_6, %c0_7] : memref<1x128xf32, #tpu.memory_space<vmem>>, vector<1x128xf32>
    tpu.vector_store %arg3[%c0_6, %c0_7], %6 {strides = array<i32>} : memref<1x128xf32, #tpu.memory_space<vmem>>, vector<1x128xf32>,
    return
  }
}

</mosaic_0001>

<bundles_post_ra>
// kernel: tpu_custom_call.1
= control target key start
LH: loop header
LB: loop body
LE: loop exit
PB: predicated region body
PF: predicated region fallthrough
CT: control target
= control target key end

     0   :  { %8 = vsyncpa [#allocation3], 0  ;;  %s255_s0 = inlined_call_operand.hbm [shape: f32[1,4], index: 0, kind: input, shape index: {}]   ;;  %s256_s1 = inlined_call_operand.hbm [shape: f32[4,128], index: 1, kind: input, shape index: {}]   ;;  %s257_s2 = inlined_call_operand.vmem [shape: f32[1,128], index: 2, kind: input, shape index: {}]   ;;  %s258_s3 = inlined_call_operand.hbm [shape: f32[1,128], index: 3, kind: output, shape index: {}]  }
   0x1   :  { %9 = vsyncpa [#allocation6], 0 }
   0x2   :  { %10 = vsyncpa [#allocation4], 0  ;;  %s218_s12 = smov [#allocation2]   ;;  %s219_s14 = smov [#allocation5]  }
   0x3   :  { %s17_s13 = sshll.u32 %s218_s12, 4  ;;  %s27_s15 = sshll.u32 %s219_s14, 4  ;;  %s18_s13 = int_to_ptr.vmem [resolvable:$true] %s17_s13  ;;  %s28_s15 = int_to_ptr.vmem [resolvable:$true] %s27_s15 }
   0x4   :  { %s160_s16 = scalar_lea.vmem %s18_s13, 16  ;;  %s164_s17 = scalar_lea.vmem %s18_s13, 32 }
   0x5   :  { %p161_p0 = scmp.ne.s32.totalorder %s18_s13, %s160_s16  ;;  %p165_p1 = scmp.lt.s32.totalorder %s18_s13, %s18_s13 }
   0x6   :  { %p166_p2 = scmp.lt.s32.totalorder %s164_s17, %s160_s16 }
   0x8   :  { %p167_p3 = por %p166_p2, %p165_p1 }
   0xa   :  { %p168_p4 = pnand %p167_p3, %p161_p0 }
   0xc   :  { %171 = shalt.err (!%p168_p4)
}
   0xd   :  { %20 = dma.hbm_to_vmem [thread:$0]  %s255_s0, 16, %s18_s13, [#allocation3]  }
   0xe   :  { %s180_s20 = scalar_lea.vmem %s28_s15, 64  ;;  %p185_p6 = scmp.lt.s32.totalorder %s28_s15, %s28_s15 }
   0xf   :  { %p181_p5 = scmp.ne.s32.totalorder %s28_s15, %s180_s20  ;;  %p186_p7 = scmp.lt.s32.totalorder %s180_s20, %s180_s20 }
  0x11   :  { %p187_p8 = por %p186_p7, %p185_p6 }
  0x13   :  { %p188_p9 = pnand %p187_p8, %p181_p5 }
  0x15   :  { %191 = shalt.err (!%p188_p9)
}
  0x16   :  { %30 = dma.hbm_to_vmem [thread:$0]  %s256_s1, 64, %s28_s15, [#allocation6]  }
  0x17   :  { %212 = dma.done.wait [#allocation3], 16  }
  0x18   :  { %213 = vsyncadd [#allocation3], 4294967280 }
  0x19   :  { %214 = dma.done.wait [#allocation6], 64  }
  0x1a   :  { %215 = vsyncadd [#allocation6], 4294967232  ;;  %v220_v0 = vmov 0.0   ;;  %vm221_vm0 = vmmov 0   ;;  %vm46_vm1 = vcmask 1043456   ;;  %vm42_vm2 = vcmask 31744  }
  0x1b   :  { %142 = vmatprep.subr.mxu0 %v220_v0  ;;  %144 = vmatprep.mubr.msk.f32.mxu0 %vm221_vm0, %v220_v0  ;;  %v40_v1 = vld [vmem:[#allocation5] sm:$0xf]  ;;  %v39_v2 = vld [vmem:[#allocation2] sm:$0x1]  ;;  %s222_s1 = smov [#allocation7]  }
  0x1c   :  { %143 = vmatpush3.msk.msra.mxu0 %vm46_vm1, %v40_v1  ;;  %v41_v3 = vld [vmem:[%s257_s2] sm:$0x1]  ;;  %s128_s24 = sshll.u32 %s222_s1, 4  ;;  %s129_s24 = int_to_ptr.vmem [resolvable:$true] %s128_s24 }
  0x1d   :  { %145 = vmatmul.mubr.msk.f32.vlgmr.msra.gmra.mxu0 %vm42_vm2, %v39_v2  ;;  %s192_s25 = scalar_lea.vmem %s129_s24, 16  ;;  %s196_s26 = scalar_lea.vmem %s129_s24, 32 }
  0x1e   :  { %p193_p10 = scmp.ne.s32.totalorder %s129_s24, %s192_s25  ;;  %p197_p11 = scmp.lt.s32.totalorder %s129_s24, %s129_s24 }
  0x1f   :  { %p198_p12 = scmp.lt.s32.totalorder %s196_s26, %s192_s25 }
  0x21   :  { %p199_p13 = por %p198_p12, %p197_p11 }
  0x23   :  { %p200_p0 = pnand %p199_p13, %p193_p10 }
  0xdd   :  { %v116_v4 = vpop.f32.mrf.mxu0 }
  0xde   :  { %v117_v5 = vadd.f32 %v116_v4, %v41_v3 }
  0xdf   :  { %v146_v6 = vpop.f32.mrf.mxu0 }
  0xe0   :  { %v120_v7 = vmax.f32 %v117_v5, 0.0 }
  0xe2   :  { %121 = vst [vmem:[#allocation7] sm:$0x1] %v120_v7 }
  0xe3   :  { %203 = shalt.err (!%p200_p0)
}
  0xe4   :  { %131 = dma.vmem_to_hbm [thread:$0]  %s129_s24, 16, %s258_s3, [#allocation4]  }
  0xe5   :  { %216 = dma.done.wait [#allocation4], 16  }
  0xe6   :  { %217 = vsyncadd [#allocation4], 4294967280 }
  0xe7   :  { %135 = vsyncpa [#allocation3], 1 }
  0xe8   :  { %136 = vsyncpa [#allocation6], 1 }
  0xe9   :  { %137 = vsyncpa [#allocation4], 1 }

</bundles_post_ra>
